<compile_context>
chip_gen: v5e
topology: v5e:2x2
jax: 0.10.0
libtpu: 0.0.40
codegen_flags: <defaults>
</compile_context>

<pallas_src>
import jax
import jax.numpy as jnp
from jax.experimental import pallas as pl
from jax.experimental.pallas import tpu as pltpu

N_STATES = 64
N_ACTIONS = 64
HIDDEN = 64


def _round_up(n, m):
    return ((n + m - 1) // m) * m


def actor_kernel(x_ref, w_ref, b_ref, o_ref):
    # x_ref: (tb, 64) f32 | w_ref: (3, 64, 64) f32 | b_ref: (3, 1, 64) f32
    x = x_ref[...]

    h = jnp.dot(x, w_ref[0], preferred_element_type=jnp.float32) + b_ref[0]
    h = jnp.maximum(h, 0.0)

    h = jnp.dot(h, w_ref[1], preferred_element_type=jnp.float32) + b_ref[1]
    h = jnp.maximum(h, 0.0)

    logits = jnp.dot(h, w_ref[2], preferred_element_type=jnp.float32) + b_ref[2]

    # numerically stable softmax over the 64 action lanes; exact divide so that
    # probabilities sum to 1 to f32 precision (PPO consumers take log-probs).
    m = jnp.max(logits, axis=-1, keepdims=True)
    p = jnp.exp(logits - m)
    denom = jnp.sum(p, axis=-1, keepdims=True)
    o_ref[...] = (p / denom).astype(o_ref.dtype)


def _choose_tile(B, block_b):
    """Batch tile: multiple of 8 sublanes, >=2 grid steps once B is big enough
    (so ("parallel",) actually splits work across v7x's two TensorCores)."""
    tb = min(block_b, _round_up(B, 8))
    if B >= 128 and pl.cdiv(B, tb) < 2:
        tb = _round_up(pl.cdiv(B, 2), 8)
    return max(tb, 8)


def actor_forward(x, packed_params, *, block_b=512):
    """x: (B, 64) float32. Returns (B, 64) action probabilities (float32)."""
    W, bias = packed_params
    B = x.shape[0]

    tb = _choose_tile(B, block_b)
    n_blocks = pl.cdiv(B, tb)

    return pl.pallas_call(
        actor_kernel,
        out_shape=jax.ShapeDtypeStruct((B, N_ACTIONS), jnp.float32),
        grid=(n_blocks,),
        in_specs=[
            # x streamed per batch tile (auto double-buffered), native 64-lane width.
            pl.BlockSpec((tb, N_STATES), lambda i: (i, 0)),
            # weights + biases VMEM-resident across all grid steps.
            pl.BlockSpec((3, HIDDEN, HIDDEN), lambda i: (0, 0, 0)),
            pl.BlockSpec((3, 1, HIDDEN), lambda i: (0, 0, 0)),
        ],
        out_specs=pl.BlockSpec((tb, N_ACTIONS), lambda i: (i, 0)),
        compiler_params=pltpu.CompilerParams(
            dimension_semantics=("parallel",)),
    )(x, W, bias)


# ----------------------------- parameters ----------------------------------

def init_params(key):
    """Raw f32 params, PyTorch-style uniform(+-1/sqrt(fan_in)) init.

    Weights stored as (in_features, out_features) so y = x @ W + b
    (== PyTorch's x @ W_t.T + b with W_t = W.T)."""
    ks = jax.random.split(key, 6)

    def u(k, shape, fan_in):
        bound = 1.0 / jnp.sqrt(fan_in)
        return jax.random.uniform(k, shape, jnp.float32, -bound, bound)

    w1 = u(ks[0], (N_STATES, HIDDEN), N_STATES)
    b1 = u(ks[1], (HIDDEN,), N_STATES)
    w2 = u(ks[2], (HIDDEN, HIDDEN), HIDDEN)
    b2 = u(ks[3], (HIDDEN,), HIDDEN)
    w3 = u(ks[4], (HIDDEN, N_ACTIONS), HIDDEN)
    b3 = u(ks[5], (N_ACTIONS,), HIDDEN)
    return (w1, b1, w2, b2, w3, b3)


def pack_params(raw):
    """Coalesce params for the kernel: (3,64,64) f32 weights, (3,1,64) f32 biases.
    (Works because n_states == hidden == n_actions == 64; otherwise pad to max.)"""
    w1, b1, w2, b2, w3, b3 = raw
    W = jnp.stack([w1, w2, w3]).astype(jnp.float32)          # (3, 64, 64)
    bias = jnp.stack([b1, b2, b3]).astype(jnp.float32)[:, None, :]  # (3, 1, 64)
    return W, bias


def reference_forward(x, raw):
    """Pure-JAX f32 reference (matches the PyTorch Actor forward)."""
    w1, b1, w2, b2, w3, b3 = raw
    h1 = jnp.maximum(x @ w1 + b1, 0.0)
    h2 = jnp.maximum(h1 @ w2 + b2, 0.0)
    return jax.nn.softmax(h2 @ w3 + b3, axis=-1)


if __name__ == "__main__":
    key = jax.random.PRNGKey(0)
    k_x, k_x2, k_p = jax.random.split(key, 3)

    raw = init_params(k_p)
    packed = pack_params(raw)

    # Small batch: single grid step (no tiling machinery overhead for tiny B).
    B = 8
    x = jax.random.normal(k_x, (B, N_STATES), jnp.float32)
    out = jax.block_until_ready(actor_forward(x, packed))
    ref = reference_forward(x, raw)

    assert out.shape == (B, N_ACTIONS)
    assert bool(jnp.all(jnp.isfinite(out)))
    assert jnp.allclose(out, ref, atol=1e-3, rtol=1e-3)
    # exact divide -> rows sum to 1 within f32 rounding
    assert jnp.allclose(jnp.sum(out, axis=-1), jnp.ones((B,)), atol=1e-4)

    # Multi-block + ragged final block: B=40 with tb=16 -> grid of 3, last block
    # masked on store (garbage rows never reach the valid output).
    B2 = 40
    x2 = jax.random.normal(k_x2, (B2, N_STATES), jnp.float32)
    out2 = jax.block_until_ready(actor_forward(x2, packed, block_b=16))
    ref2 = reference_forward(x2, raw)
    assert out2.shape == (B2, N_ACTIONS)
    assert bool(jnp.all(jnp.isfinite(out2)))
    assert jnp.allclose(out2, ref2, atol=1e-3, rtol=1e-3)
    assert jnp.allclose(jnp.sum(out2, axis=-1), jnp.ones((B2,)), atol=1e-4)

    print("KERNEL_OK")
</pallas_src>

<mosaic_0001>
module attributes {stable_mosaic.version = 11 : i64} {
  func.func @actor_kernel(%arg0: i32, %arg1: memref<8x64xf32, #tpu.memory_space<vmem>>, %arg2: memref<3x64x64xf32, #tpu.memory_space<vmem>>, %arg3: memref<3x1x64xf32, #tpu.memory_space<vmem>>, %arg4: memref<8x64xf32, #tpu.memory_space<vmem>>) attributes {dimension_semantics = [#tpu.dimension_semantics<parallel>], iteration_bounds = array<i64: 1>, scalar_prefetch = 0 : i64, scratch_operands = 0 : i64, tpu.core_type = #tpu.core_type<tc>, window_params = [{transform_indices = @transform_0, window_bounds = array<i64: 8, 64>}, {pipeline_mode = #tpu.pipeline_mode<synchronous>, transform_indices = @transform_1, window_bounds = array<i64: 3, 64, 64>}, {pipeline_mode = #tpu.pipeline_mode<synchronous>, transform_indices = @transform_2, window_bounds = array<i64: 3, 1, 64>}, {transform_indices = @transform_3, window_bounds = array<i64: 8, 64>}]} {
    %c0 = arith.constant 0 : index
    %c0_0 = arith.constant 0 : index
    %0 = vector.load %arg1[%c0, %c0_0] : memref<8x64xf32, #tpu.memory_space<vmem>>, vector<8x64xf32>
    %c0_1 = arith.constant 0 : index
    %c0_2 = arith.constant 0 : index
    %c0_3 = arith.constant 0 : index
    %1 = vector.load %arg2[%c0_1, %c0_2, %c0_3] : memref<3x64x64xf32, #tpu.memory_space<vmem>>, vector<1x64x64xf32>
    %2 = vector.shape_cast %1 : vector<1x64x64xf32> to vector<64x64xf32>
    %cst = arith.constant dense<0.000000e+00> : vector<8x64xf32>
    %3 = tpu.matmul %0, %2, %cst {dimension_numbers = #tpu.dot_dimension_numbers<[1], [0], [0], [1], [0, 0, 1, 1], [], []>} : vector<8x64xf32>, vector<64x64xf32>, vector<8x64xf32> -> vector<8x64xf32>
    %c0_4 = arith.constant 0 : index
    %c0_5 = arith.constant 0 : index
    %c0_6 = arith.constant 0 : index
    %4 = vector.load %arg3[%c0_4, %c0_5, %c0_6] : memref<3x1x64xf32, #tpu.memory_space<vmem>>, vector<1x1x64xf32>
    %5 = vector.shape_cast %4 : vector<1x1x64xf32> to vector<1x64xf32>
    %6 = vector.broadcast %5 : vector<1x64xf32> to vector<8x64xf32>
    %7 = arith.addf %3, %6 : vector<8x64xf32>
    %cst_7 = arith.constant 0.000000e+00 : f32
    %8 = vector.broadcast %cst_7 : f32 to vector<8x64xf32>
    %9 = arith.maximumf %7, %8 : vector<8x64xf32>
    %c1 = arith.constant 1 : index
    %c0_8 = arith.constant 0 : index
    %c0_9 = arith.constant 0 : index
    %10 = vector.load %arg2[%c1, %c0_8, %c0_9] : memref<3x64x64xf32, #tpu.memory_space<vmem>>, vector<1x64x64xf32>
    %11 = vector.shape_cast %10 : vector<1x64x64xf32> to vector<64x64xf32>
    %cst_10 = arith.constant dense<0.000000e+00> : vector<8x64xf32>
    %12 = tpu.matmul %9, %11, %cst_10 {dimension_numbers = #tpu.dot_dimension_numbers<[1], [0], [0], [1], [0, 0, 1, 1], [], []>} : vector<8x64xf32>, vector<64x64xf32>, vector<8x64xf32> -> vector<8x64xf32>
    %c1_11 = arith.constant 1 : index
    %c0_12 = arith.constant 0 : index
    %c0_13 = arith.constant 0 : index
    %13 = vector.load %arg3[%c1_11, %c0_12, %c0_13] : memref<3x1x64xf32, #tpu.memory_space<vmem>>, vector<1x1x64xf32>
    %14 = vector.shape_cast %13 : vector<1x1x64xf32> to vector<1x64xf32>
    %15 = vector.broadcast %14 : vector<1x64xf32> to vector<8x64xf32>
    %16 = arith.addf %12, %15 : vector<8x64xf32>
    %cst_14 = arith.constant 0.000000e+00 : f32
    %17 = vector.broadcast %cst_14 : f32 to vector<8x64xf32>
    %18 = arith.maximumf %16, %17 : vector<8x64xf32>
    %c2 = arith.constant 2 : index
    %c0_15 = arith.constant 0 : index
    %c0_16 = arith.constant 0 : index
    %19 = vector.load %arg2[%c2, %c0_15, %c0_16] : memref<3x64x64xf32, #tpu.memory_space<vmem>>, vector<1x64x64xf32>
    %20 = vector.shape_cast %19 : vector<1x64x64xf32> to vector<64x64xf32>
    %cst_17 = arith.constant dense<0.000000e+00> : vector<8x64xf32>
    %21 = tpu.matmul %18, %20, %cst_17 {dimension_numbers = #tpu.dot_dimension_numbers<[1], [0], [0], [1], [0, 0, 1, 1], [], []>} : vector<8x64xf32>, vector<64x64xf32>, vector<8x64xf32> -> vector<8x64xf32>
    %c2_18 = arith.constant 2 : index
    %c0_19 = arith.constant 0 : index
    %c0_20 = arith.constant 0 : index
    %22 = vector.load %arg3[%c2_18, %c0_19, %c0_20] : memref<3x1x64xf32, #tpu.memory_space<vmem>>, vector<1x1x64xf32>
    %23 = vector.shape_cast %22 : vector<1x1x64xf32> to vector<1x64xf32>
    %24 = vector.broadcast %23 : vector<1x64xf32> to vector<8x64xf32>
    %25 = arith.addf %21, %24 : vector<8x64xf32>
    %cst_21 = arith.constant dense<0xFF800000> : vector<8xf32>
    %26 = vector.multi_reduction <maximumf>, %25, %cst_21 [1] : vector<8x64xf32> to vector<8xf32>
    %27 = vector.shape_cast %26 : vector<8xf32> to vector<8x1xf32>
    %28 = vector.broadcast %27 : vector<8x1xf32> to vector<8x64xf32>
    %29 = arith.subf %25, %28 : vector<8x64xf32>
    %30 = math.exp %29 : vector<8x64xf32>
    %cst_22 = arith.constant dense<0.000000e+00> : vector<8xf32>
    %31 = vector.multi_reduction <add>, %30, %cst_22 [1] : vector<8x64xf32> to vector<8xf32>
    %32 = vector.shape_cast %31 : vector<8xf32> to vector<8x1xf32>
    %33 = vector.broadcast %32 : vector<8x1xf32> to vector<8x64xf32>
    %34 = arith.divf %30, %33 : vector<8x64xf32>
    %c0_23 = arith.constant 0 : index
    %c0_24 = arith.constant 0 : index
    %35 = vector.load %arg4[%c0_23, %c0_24] : memref<8x64xf32, #tpu.memory_space<vmem>>, vector<8x64xf32>
    tpu.vector_store %arg4[%c0_23, %c0_24], %34 {strides = array<i32>} : memref<8x64xf32, #tpu.memory_space<vmem>>, vector<8x64xf32>,
    return
  }
  func.func @transform_0(%arg0: i32) -> (i32, i32) {
    %c0_i32 = arith.constant 0 : i32
    %c0_i32_0 = arith.constant 0 : i32
    return %arg0, %c0_i32 : i32, i32
  }
  func.func @transform_1(%arg0: i32) -> (i32, i32, i32) {
    %c0_i32 = arith.constant 0 : i32
    %c0_i32_0 = arith.constant 0 : i32
    %c0_i32_1 = arith.constant 0 : i32
    %c0_i32_2 = arith.constant 0 : i32
    return %c0_i32, %c0_i32_0, %c0_i32_1 : i32, i32, i32
  }
  func.func @transform_2(%arg0: i32) -> (i32, i32, i32) {
    %c0_i32 = arith.constant 0 : i32
    %c0_i32_0 = arith.constant 0 : i32
    %c0_i32_1 = arith.constant 0 : i32
    %c0_i32_2 = arith.constant 0 : i32
    return %c0_i32, %c0_i32_0, %c0_i32_1 : i32, i32, i32
  }
  func.func @transform_3(%arg0: i32) -> (i32, i32) {
    %c0_i32 = arith.constant 0 : i32
    %c0_i32_0 = arith.constant 0 : i32
    return %arg0, %c0_i32 : i32, i32
  }
}

</mosaic_0001>

<bundles_post_ra>
// kernel: tpu_custom_call.1
= control target key start
LH: loop header
LB: loop body
LE: loop exit
PB: predicated region body
PF: predicated region fallthrough
CT: control target
= control target key end

     0   :  { %8 = vsyncpa [#allocation3], 0  ;;  %s382_s0 = inlined_call_operand.hbm [shape: f32[8,64], index: 0, kind: input, shape index: {}]   ;;  %s383_s1 = inlined_call_operand.hbm [shape: f32[3,64,64], index: 1, kind: input, shape index: {}]   ;;  %s384_s2 = inlined_call_operand.hbm [shape: f32[3,1,64], index: 2, kind: input, shape index: {}]   ;;  %s385_s3 = inlined_call_operand.hbm [shape: f32[8,64], index: 3, kind: output, shape index: {}]  }
   0x1   :  { %9 = vsyncpa [#allocation6], 0  ;;  %s26_s14 = sshll.u32 %s383_s1, 4  ;;  %s27_s14 = int_to_ptr.hbm [resolvable:$true] %s26_s14 }
   0x2   :  { %10 = vsyncpa [#allocation4], 0  ;;  %s336_s15 = smov [#allocation5]   ;;  %s16_s19 = sshll.u32 %s382_s0, 4  ;;  %s17_s19 = int_to_ptr.hbm [resolvable:$true] %s16_s19 }
   0x3   :  { %s28_s16 = sshll.u32 %s336_s15, 4  ;;  %s337_s20 = smov 128   ;;  %s29_s16 = int_to_ptr.vmem [resolvable:$true] %s28_s16 }
   0x4   :  { %s338_s21 = smov 8   ;;  %s339_s22 = smov [#allocation2]  }
   0x5   :  { %34 = dma.hbm_to_vmem [thread:$0]  %s27_s14, 3072, %s29_s16, [#allocation6], %s337_s20, %s337_s20, %s338_s21  }
   0x6   :  { %s18_s23 = sshll.u32 %s339_s22, 4  ;;  %s39_s26 = sshll.u32 %s384_s2, 4  ;;  %s19_s23 = int_to_ptr.vmem [resolvable:$true] %s18_s23  ;;  %s40_s26 = int_to_ptr.hbm [resolvable:$true] %s39_s26 }
   0x7   :  { %21 = dma.hbm_to_vmem [thread:$0]  %s17_s19, 128, %s19_s23, [#allocation3]  }
   0x8   :  { %s340_s1 = smov [#allocation7]   ;;  %s341_s28 = smov 16  }
   0x9   :  { %s41_s27 = sshll.u32 %s340_s1, 4  ;;  %s342_s29 = smov 1   ;;  %s42_s27 = int_to_ptr.vmem [resolvable:$true] %s41_s27 }
   0xa   :  { %47 = dma.hbm_to_vmem [thread:$0]  %s40_s26, 48, %s42_s27, [#allocation6], %s341_s28, %s341_s28, %s342_s29  }
   0xb   :  { %330 = dma.done.wait [#allocation3], 128  }
   0xc   :  { %331 = vsyncadd [#allocation3], 4294967168 }
   0xd   :  { %332 = dma.done.wait [#allocation6], 3120  }
   0xe   :  { %333 = vsyncadd [#allocation6], 4294964176  ;;  %v68_v0 = vld [vmem:[#allocation5 + $0x38] sm:$0xff]  ;;  %v67_v1 = vld [vmem:[#allocation5 + $0x30] sm:$0xff]  ;;  %vm73_vm0 = vcmask 523264   ;;  %s343_s0 = smov [#allocation8]  }
   0xf   :  { %85 = vmatpush.msra.mxu0 %v68_v0  ;;  %v66_v2 = vld [vmem:[#allocation5 + $0x28] sm:$0xff]  ;;  %v106_v3 = vld [vmem:[#allocation5 + $0x78] sm:$0xff]  ;;  %v105_v4 = vld [vmem:[#allocation5 + $0x70] sm:$0xff]  ;;  %s203_s2 = sshll.u32 %s343_s0, 4  ;;  %s205_s5 = sshll.u32 %s385_s3, 4  ;;  %s204_s2 = int_to_ptr.vmem [resolvable:$true] %s203_s2  ;;  %s206_s5 = int_to_ptr.hbm [resolvable:$true] %s205_s5 }
  0x10   :  { %v65_v5 = vld [vmem:[#allocation5 + $0x20] sm:$0xff]  ;;  %123 = vmatpush.msra.mxu1 %v106_v3  ;;  %v104_v6 = vld [vmem:[#allocation5 + $0x68] sm:$0xff]  ;;  %v64_v7 = vld [vmem:[#allocation5 + $0x18] sm:$0xff] }
  0x11   :  { %86 = vmatpush.msra.mxu0 %v67_v1  ;;  %v103_v8 = vld [vmem:[#allocation5 + $0x60] sm:$0xff]  ;;  %v63_v9 = vld [vmem:[#allocation5 + $0x10] sm:$0xff]  ;;  %v102_v10 = vld [vmem:[#allocation5 + $0x58] sm:$0xff] }
  0x12   :  { %124 = vmatpush.msra.mxu1 %v105_v4  ;;  %v62_v11 = vld [vmem:[#allocation5 + $0x8] sm:$0xff]  ;;  %v61_v12 = vld [vmem:[#allocation5] sm:$0xff]  ;;  %v60_v13 = vld [vmem:[#allocation2] sm:$0xff] }
  0x13   :  { %87 = vmatpush.msra.mxu0 %v66_v2  ;;  %v101_v14 = vld [vmem:[#allocation5 + $0x50] sm:$0xff]  ;;  %v100_v15 = vld [vmem:[#allocation5 + $0x48] sm:$0xff]  ;;  %v99_v16 = vld [vmem:[#allocation5 + $0x40] sm:$0xff] }
  0x14   :  { %125 = vmatpush.msra.mxu1 %v104_v6  ;;  %v144_v17 = vld [vmem:[#allocation5 + $0xb8] sm:$0xff]  ;;  %v143_v18 = vld [vmem:[#allocation5 + $0xb0] sm:$0xff]  ;;  %v142_v19 = vld [vmem:[#allocation5 + $0xa8] sm:$0xff] }
  0x15   :  { %88 = vmatpush.msra.mxu0 %v65_v5  ;;  %161 = vmatpush.msra.mxu2 %v144_v17  ;;  %v141_v20 = vld [vmem:[#allocation5 + $0xa0] sm:$0xff]  ;;  %v140_v21 = vld [vmem:[#allocation5 + $0x98] sm:$0xff]  ;;  %v139_v26 = vld [vmem:[#allocation5 + $0x90] sm:$0xff] }
  0x16   :  { %126 = vmatpush.msra.mxu1 %v103_v8  ;;  %v227_v22 = vld [vmem:[#allocation7] ss:$0 sm:$0xff]  ;;  %v138_v27 = vld [vmem:[#allocation5 + $0x88] sm:$0xff]  ;;  %v228_v29 = vld [vmem:[#allocation7 + $0x1] ss:$0 sm:$0xff] }
  0x17   :  { %89 = vmatpush.msra.mxu0 %v64_v7  ;;  %162 = vmatpush.msra.mxu2 %v143_v18  ;;  %v137_v28 = vld [vmem:[#allocation5 + $0x80] sm:$0xff] }
  0x18   :  { %127 = vmatpush.msra.mxu1 %v102_v10  ;;  %v229_v33 = vld [vmem:[#allocation7 + $0x2] ss:$0 sm:$0xff] }
  0x19   :  { %90 = vmatpush.msra.mxu0 %v63_v9  ;;  %163 = vmatpush.msra.mxu2 %v142_v19 }
  0x1a   :  { %128 = vmatpush.msra.mxu1 %v101_v14 }
  0x1b   :  { %91 = vmatpush.msra.mxu0 %v62_v11  ;;  %164 = vmatpush.msra.mxu2 %v141_v20 }
  0x1c   :  { %129 = vmatpush.msra.mxu1 %v100_v15 }
  0x1d   :  { %92 = vmatpush.msra.mxu0 %v61_v12  ;;  %165 = vmatpush.msra.mxu2 %v140_v21 }
  0x1e   :  { %216 = vmatmul.msk.f32.vlgmr.msra.gmra.mxu0 %vm73_vm0, %v60_v13  ;;  %130 = vmatpush.msra.mxu1 %v99_v16 }
  0x1f   :  { %166 = vmatpush.msra.mxu2 %v139_v26 }
  0x21   :  { %167 = vmatpush.msra.mxu2 %v138_v27 }
  0x23   :  { %168 = vmatpush.msra.mxu2 %v137_v28 }
  0x9b   :  { %v94_v23 = vpop.f32.mrf.mxu0 }
  0x9c   :  { %v95_v24 = vadd.f32 %v227_v22, %v94_v23 }
  0x9e   :  { %v97_v25 = vmax.f32 %v95_v24, 0.0 }
  0xa0   :  { %217 = vmatmul.msk.f32.vlgmr.msra.gmra.mxu1 %vm73_vm0, %v97_v25 }
 0x11d   :  { %v132_v30 = vpop.f32.mrf.mxu1 }
 0x11e   :  { %v133_v31 = vadd.f32 %v228_v29, %v132_v30 }
 0x120   :  { %v135_v32 = vmax.f32 %v133_v31, 0.0 }
 0x122   :  { %218 = vmatmul.msk.f32.vlgmr.msra.gmra.mxu2 %vm73_vm0, %v135_v32 }
 0x1a5   :  { %v170_v34 = vpop.f32.mrf.mxu2 }
 0x1a6   :  { %v171_v35 = vadd.f32 %v229_v33, %v170_v34 }
 0x1a8   :  { %v173_v36 = vsel %vm73_vm0, %v171_v35, -inf }
 0x1a9   :  { %174 = vmax.xlane.f32.xlu0 %v173_v36 }
 0x21c   :  { %v175_v37 = vpop.xlane.xlu0 %174 }
 0x21d   :  { %v176_v38 = vsub.f32 %v171_v35, %v175_v37 }
 0x21f   :  { %v177_v39 = vmul.f32 1.442695, %v176_v38 }
 0x221   :  { %230 = vpow2.f32 %v177_v39 }
 0x227   :  { %v231_v40 = vpop.eup %230 }
 0x228   :  { %v179_v41 = vsel %vm73_vm0, %v231_v40, 0.0 }
 0x229   :  { %180 = vadd.xlane.f32.xlu0 %v179_v41 }
 0x29c   :  { %v181_v42 = vpop.xlane.xlu0 %180 }
 0x29d   :  { %232 = vrcp.f32 %v181_v42  ;;  %v193_v46 = vand.u32 2147483648, %v181_v42  ;;  %v191_v48 = vand.u32 2147483647, %v181_v42  ;;  %vm187_vm2 = vweird.f32 %v181_v42 }
 0x29f   :  { %v194_v50 = vor.u32 1.1754944e-38, %v193_v46  ;;  %vm192_vm4 = vcmp.eq.f32.partialorder %v191_v48, 8.507059e+37 }
 0x2a3   :  { %v233_v43 = vpop.eup %232 }
 0x2a4   :  { %v183_v44 = vmul.f32 %v233_v43, %v181_v42  ;;  %vm188_vm1 = vweird.f32 %v233_v43 }
 0x2a5   :  { %vm189_vm3 = vmor %vm187_vm2, %vm188_vm1 }
 0x2a6   :  { %v184_v45 = vsub.f32 1.0, %v183_v44 }
 0x2a8   :  { %v185_v47 = vmul.f32 %v233_v43, %v184_v45 }
 0x2aa   :  { %v186_v49 = vadd.f32 %v233_v43, %v185_v47 }
 0x2ac   :  { %v190_v51 = vsel %vm189_vm3, %v233_v43, %v186_v49 }
 0x2ad   :  { %v195_v52 = vsel %vm192_vm4, %v194_v50, %v190_v51 }
 0x2ae   :  { %v196_v53 = vmul.f32 %v231_v40, %v195_v52 }
 0x2b0   :  { %197 = vst.msk [vmem:[#allocation8] sm:$0xff] %vm73_vm0, %v196_v53 }
 0x2b1   :  { %208 = dma.vmem_to_hbm [thread:$0]  %s204_s2, 128, %s206_s5, [#allocation4]  }
 0x2b2   :  { %334 = dma.done.wait [#allocation4], 128  }
 0x2b3   :  { %335 = vsyncadd [#allocation4], 4294967168 }
 0x2b4   :  { %213 = vsyncpa [#allocation3], 1 }
 0x2b5   :  { %214 = vsyncpa [#allocation6], 1 }
 0x2b6   :  { %215 = vsyncpa [#allocation4], 1 }

</bundles_post_ra>
